<compile_context>
chip_gen: v7x
topology: tpu7x:2x2x1
jax: 0.10.0
libtpu: 0.0.40
codegen_flags: <defaults>
</compile_context>

<pallas_src>
import functools

import jax
import jax.numpy as jnp
from jax.experimental import pallas as pl
from jax.experimental.pallas import tpu as pltpu

EPS = 1e-5
LANE = 128


def _round_up(x, m):
    return ((x + m - 1) // m) * m


def _pick_tile(c_out_padded):
    """Largest lane-multiple tile (<= 512) that evenly divides the padded C_out."""
    for cand in (512, 384, 256, 128):
        if c_out_padded % cand == 0:
            return cand
    return LANE


def _mlp_kernel(x_ref, w_ref, gamma_ref, beta_ref, o_ref, *,
                use_bn, activation, inv_n):
    # Linear (no bias): MXU matmul with f32 accumulation.
    y = jnp.dot(x_ref[...], w_ref[...], preferred_element_type=jnp.float32)

    if use_bn:
        # Training-mode BatchNorm1d: batch stats over the (fully resident) N axis.
        # Single-pass variance: E[y^2] - E[y]^2 (biased, matching PyTorch normalization).
        mean = jnp.sum(y, axis=0, keepdims=True) * inv_n
        mean_sq = jnp.sum(y * y, axis=0, keepdims=True) * inv_n
        var = jnp.maximum(mean_sq - mean * mean, 0.0)
        y = (y - mean) * jax.lax.rsqrt(var + EPS)
        y = y * gamma_ref[...] + beta_ref[...]

    if activation == "relu":
        y = jnp.maximum(y, 0.0)
    # activation is None -> passthrough

    o_ref[...] = y.astype(o_ref.dtype)


def mlp_forward(x, w_t, gamma, beta, *, use_bn=True, activation=None,
                matmul_dtype=None):
    """Fused Linear + BN + activation.

    x: [N, C_in], w_t: [C_in, C_out] (nn.Linear weight transposed),
    gamma/beta: [1, C_out].  Returns [N, C_out] in x.dtype.
    matmul_dtype: optionally cast the MXU feed (e.g. jnp.bfloat16 on v6e/v7x);
                  accumulation and BN math stay f32.
    """
    n, c_in = x.shape
    c_out = w_t.shape[1]
    out_dtype = x.dtype

    # Lane-dense output: pad C_out up to a multiple of 128, slice off afterwards.
    c_out_p = _round_up(c_out, LANE)
    tile_c = _pick_tile(c_out_p)
    pad = c_out_p - c_out
    if pad:
        w_t = jnp.pad(w_t, ((0, 0), (0, pad)))
        gamma = jnp.pad(gamma, ((0, 0), (0, pad)), constant_values=1.0)
        beta = jnp.pad(beta, ((0, 0), (0, pad)))

    if matmul_dtype is not None:
        x = x.astype(matmul_dtype)
        w_t = w_t.astype(matmul_dtype)

    kernel = functools.partial(
        _mlp_kernel, use_bn=use_bn, activation=activation, inv_n=1.0 / float(n))

    grid = (c_out_p // tile_c,)

    in_itemsize = jnp.dtype(x.dtype).itemsize
    cost = pl.CostEstimate(
        flops=2 * n * c_in * c_out_p,
        transcendentals=c_out_p if use_bn else 0,
        bytes_accessed=(in_itemsize * (n * c_in + c_in * c_out_p)
                        + 4 * 2 * c_out_p
                        + jnp.dtype(out_dtype).itemsize * n * c_out_p),
    )

    out = pl.pallas_call(
        kernel,
        out_shape=jax.ShapeDtypeStruct((n, c_out_p), out_dtype),
        grid_spec=pltpu.PrefetchScalarGridSpec(
            num_scalar_prefetch=0,
            grid=grid,
            in_specs=[
                # Full N x C_in activations resident every step (BN needs whole batch).
                pl.BlockSpec((n, c_in), lambda j: (0, 0)),
                # C_out-tiled weights / affine params / output: lane-dense (128-multiple).
                pl.BlockSpec((c_in, tile_c), lambda j: (0, j)),
                pl.BlockSpec((1, tile_c), lambda j: (0, j)),
                pl.BlockSpec((1, tile_c), lambda j: (0, j)),
            ],
            out_specs=pl.BlockSpec((n, tile_c), lambda j: (0, j)),
        ),
        compiler_params=pltpu.CompilerParams(
            # Each C_out tile is independent -> shardable across TensorCores (v7x).
            dimension_semantics=("parallel",),
            # Explicit budget; safe on v7x (64 MiB physical, 32 MiB default scoped).
            vmem_limit_bytes=32 * 1024 * 1024,
        ),
        cost_estimate=cost,
    )(x, w_t, gamma, beta)

    return out[:, :c_out] if pad else out


def mlp_reference(x, w_t, gamma, beta, *, use_bn=True, activation=None):
    """Plain-JAX reference mirroring PyTorch MLP forward (training-mode BN)."""
    y = x @ w_t
    if use_bn:
        mean = jnp.mean(y, axis=0, keepdims=True)
        var = jnp.mean((y - mean) ** 2, axis=0, keepdims=True)
        y = (y - mean) / jnp.sqrt(var + EPS)
        y = y * gamma + beta
    if activation == "relu":
        y = jnp.maximum(y, 0.0)
    return y


if __name__ == "__main__":
    # Small shapes consistent with MLP(in_channels=32, out_channels=64) on a
    # batch of 16 points.  C_out=64 exercises the lane-padding (-> 128) path.
    N, C_IN, C_OUT = 16, 32, 64

    key = jax.random.PRNGKey(0)
    kx, kw = jax.random.split(key)

    x = jax.random.normal(kx, (N, C_IN), dtype=jnp.float32)

    # nn.Linear weight is [out, in]; store transposed [in, out] for the kernel.
    # Deterministic synthetic init (uniform, Kaiming-like bound).
    bound = 1.0 / jnp.sqrt(jnp.float32(C_IN))
    w = jax.random.uniform(kw, (C_OUT, C_IN), dtype=jnp.float32,
                           minval=-bound, maxval=bound)
    w_t = w.T  # [C_IN, C_OUT]

    # BatchNorm affine params: default init gamma=1, beta=0 (kept 2D for TPU).
    gamma = jnp.ones((1, C_OUT), dtype=jnp.float32)
    beta = jnp.zeros((1, C_OUT), dtype=jnp.float32)

    # Exercise the full path: bn=True, activation=ReLU, f32 MXU feed
    # (pass matmul_dtype=jnp.bfloat16 on v6e/v7x for ~2x MXU throughput at scale).
    out = mlp_forward(x, w_t, gamma, beta, use_bn=True, activation="relu")
    out = jax.block_until_ready(out)

    ref = mlp_reference(x, w_t, gamma, beta, use_bn=True, activation="relu")
    assert out.shape == (N, C_OUT)
    assert jnp.allclose(out, ref, atol=1e-4, rtol=1e-4), "mismatch vs reference"

    # Also check the no-BN / no-activation path (pure linear).
    out2 = jax.block_until_ready(
        mlp_forward(x, w_t, gamma, beta, use_bn=False, activation=None))
    ref2 = mlp_reference(x, w_t, gamma, beta, use_bn=False, activation=None)
    assert jnp.allclose(out2, ref2, atol=1e-4, rtol=1e-4), "mismatch (no-BN path)"

    print("KERNEL_OK")
</pallas_src>

<mosaic_0001>
module attributes {stable_mosaic.version = 11 : i64} {
  func.func @_mlp_kernel(%arg0: i32, %arg1: memref<16x32xf32, #tpu.memory_space<vmem>>, %arg2: memref<32x128xf32, #tpu.memory_space<vmem>>, %arg3: memref<1x128xf32, #tpu.memory_space<vmem>>, %arg4: memref<1x128xf32, #tpu.memory_space<vmem>>, %arg5: memref<16x128xf32, #tpu.memory_space<vmem>>) attributes {dimension_semantics = [#tpu.dimension_semantics<parallel>], iteration_bounds = array<i64: 1>, scalar_prefetch = 0 : i64, scratch_operands = 0 : i64, tpu.core_type = #tpu.core_type<tc>, window_params = [{pipeline_mode = #tpu.pipeline_mode<synchronous>, transform_indices = @transform_0, window_bounds = array<i64: 16, 32>}, {transform_indices = @transform_1, window_bounds = array<i64: 32, 128>}, {transform_indices = @transform_2, window_bounds = array<i64: 1, 128>}, {transform_indices = @transform_3, window_bounds = array<i64: 1, 128>}, {transform_indices = @transform_4, window_bounds = array<i64: 16, 128>}]} {
    %c0 = arith.constant 0 : index
    %c0_0 = arith.constant 0 : index
    %0 = vector.load %arg1[%c0, %c0_0] : memref<16x32xf32, #tpu.memory_space<vmem>>, vector<16x32xf32>
    %c0_1 = arith.constant 0 : index
    %c0_2 = arith.constant 0 : index
    %1 = vector.load %arg2[%c0_1, %c0_2] : memref<32x128xf32, #tpu.memory_space<vmem>>, vector<32x128xf32>
    %cst = arith.constant dense<0.000000e+00> : vector<16x128xf32>
    %2 = tpu.matmul %0, %1, %cst {dimension_numbers = #tpu.dot_dimension_numbers<[1], [0], [0], [1], [0, 0, 1, 1], [], []>} : vector<16x32xf32>, vector<32x128xf32>, vector<16x128xf32> -> vector<16x128xf32>
    %cst_3 = arith.constant dense<0.000000e+00> : vector<128xf32>
    %3 = vector.multi_reduction <add>, %2, %cst_3 [0] : vector<16x128xf32> to vector<128xf32>
    %4 = vector.shape_cast %3 : vector<128xf32> to vector<1x128xf32>
    %cst_4 = arith.constant 6.250000e-02 : f32
    %5 = vector.broadcast %cst_4 : f32 to vector<1x128xf32>
    %6 = arith.mulf %4, %5 : vector<1x128xf32>
    %7 = arith.mulf %2, %2 : vector<16x128xf32>
    %cst_5 = arith.constant dense<0.000000e+00> : vector<128xf32>
    %8 = vector.multi_reduction <add>, %7, %cst_5 [0] : vector<16x128xf32> to vector<128xf32>
    %9 = vector.shape_cast %8 : vector<128xf32> to vector<1x128xf32>
    %cst_6 = arith.constant 6.250000e-02 : f32
    %10 = vector.broadcast %cst_6 : f32 to vector<1x128xf32>
    %11 = arith.mulf %9, %10 : vector<1x128xf32>
    %12 = arith.mulf %6, %6 : vector<1x128xf32>
    %13 = arith.subf %11, %12 : vector<1x128xf32>
    %cst_7 = arith.constant 0.000000e+00 : f32
    %14 = vector.broadcast %cst_7 : f32 to vector<1x128xf32>
    %15 = arith.maximumf %13, %14 : vector<1x128xf32>
    %16 = vector.broadcast %6 : vector<1x128xf32> to vector<16x128xf32>
    %17 = arith.subf %2, %16 : vector<16x128xf32>
    %cst_8 = arith.constant 9.99999974E-6 : f32
    %18 = vector.broadcast %cst_8 : f32 to vector<1x128xf32>
    %19 = arith.addf %15, %18 : vector<1x128xf32>
    %20 = math.rsqrt %19 : vector<1x128xf32>
    %21 = vector.broadcast %20 : vector<1x128xf32> to vector<16x128xf32>
    %22 = arith.mulf %17, %21 : vector<16x128xf32>
    %c0_9 = arith.constant 0 : index
    %c0_10 = arith.constant 0 : index
    %23 = vector.load %arg3[%c0_9, %c0_10] : memref<1x128xf32, #tpu.memory_space<vmem>>, vector<1x128xf32>
    %24 = vector.broadcast %23 : vector<1x128xf32> to vector<16x128xf32>
    %25 = arith.mulf %22, %24 : vector<16x128xf32>
    %c0_11 = arith.constant 0 : index
    %c0_12 = arith.constant 0 : index
    %26 = vector.load %arg4[%c0_11, %c0_12] : memref<1x128xf32, #tpu.memory_space<vmem>>, vector<1x128xf32>
    %27 = vector.broadcast %26 : vector<1x128xf32> to vector<16x128xf32>
    %28 = arith.addf %25, %27 : vector<16x128xf32>
    %cst_13 = arith.constant 0.000000e+00 : f32
    %29 = vector.broadcast %cst_13 : f32 to vector<16x128xf32>
    %30 = arith.maximumf %28, %29 : vector<16x128xf32>
    %c0_14 = arith.constant 0 : index
    %c0_15 = arith.constant 0 : index
    %31 = vector.load %arg5[%c0_14, %c0_15] : memref<16x128xf32, #tpu.memory_space<vmem>>, vector<16x128xf32>
    tpu.vector_store %arg5[%c0_14, %c0_15], %30 {strides = array<i32>} : memref<16x128xf32, #tpu.memory_space<vmem>>, vector<16x128xf32>,
    return
  }
  func.func @transform_0(%arg0: i32) -> (i32, i32) {
    %c0_i32 = arith.constant 0 : i32
    %c0_i32_0 = arith.constant 0 : i32
    %c0_i32_1 = arith.constant 0 : i32
    return %c0_i32, %c0_i32_0 : i32, i32
  }
  func.func @transform_1(%arg0: i32) -> (i32, i32) {
    %c0_i32 = arith.constant 0 : i32
    %c0_i32_0 = arith.constant 0 : i32
    return %c0_i32, %arg0 : i32, i32
  }
  func.func @transform_2(%arg0: i32) -> (i32, i32) {
    %c0_i32 = arith.constant 0 : i32
    %c0_i32_0 = arith.constant 0 : i32
    return %c0_i32, %arg0 : i32, i32
  }
  func.func @transform_3(%arg0: i32) -> (i32, i32) {
    %c0_i32 = arith.constant 0 : i32
    %c0_i32_0 = arith.constant 0 : i32
    return %c0_i32, %arg0 : i32, i32
  }
  func.func @transform_4(%arg0: i32) -> (i32, i32) {
    %c0_i32 = arith.constant 0 : i32
    %c0_i32_0 = arith.constant 0 : i32
    return %c0_i32, %arg0 : i32, i32
  }
}

</mosaic_0001>

<bundles_post_ra>
// kernel: tpu_custom_call.1
= control target key start
LH: loop header
LB: loop body
LE: loop exit
PB: predicated region body
PF: predicated region fallthrough
CT: control target
= control target key end

     0   :  { %9 = vsyncpa [#allocation3], 0  ;;  %s390_s0 = inlined_call_operand.hbm [shape: f32[16,32], index: 0, kind: input, shape index: {}]   ;;  %s391_s1 = inlined_call_operand.hbm [shape: f32[32,128], index: 1, kind: input, shape index: {}]   ;;  %s392_s2 = inlined_call_operand.vmem [shape: f32[1,128], index: 2, kind: input, shape index: {}]   ;;  %s393_s3 = inlined_call_operand.vmem [shape: f32[1,128], index: 3, kind: input, shape index: {}]   ;;  %s394_s4 = inlined_call_operand.hbm [shape: f32[16,128], index: 4, kind: output, shape index: {}]  }
   0x1   :  { %10 = vsyncpa [#allocation6], 0 }
   0x2   :  { %11 = vsyncpa [#allocation4], 0  ;;  %s309_s15 = smov [#allocation2]   ;;  %s237_s19 = scalar_lea.hbm %s390_s0, 256 }
   0x3   :  { %s17_s16 = sshll.u32 %s309_s15, 4  ;;  %p238_p0 = scmp.ne.s32.totalorder %s390_s0, %s237_s19  ;;  %s18_s16 = int_to_ptr.vmem [resolvable:$true] %s17_s16 }
   0x4   :  { %p241_p1 = scmp.lt.u32.totalorder %s237_s19, %s390_s0 }
   0x6   :  { %p243_p2 = pnand %p241_p1, %p238_p0 }
   0x8   :  { %246 = shalt.err (!%p243_p2)
}
   0x9   :  { %s247_s24 = scalar_lea.vmem %s18_s16, 256  ;;  %p252_p4 = scmp.lt.s32.totalorder %s18_s16, %s18_s16 }
   0xa   :  { %p248_p3 = scmp.ne.s32.totalorder %s18_s16, %s247_s24  ;;  %p253_p5 = scmp.lt.s32.totalorder %s247_s24, %s247_s24 }
   0xc   :  { %p254_p6 = por %p253_p5, %p252_p4 }
   0xe   :  { %p255_p7 = pnand %p254_p6, %p248_p3 }
  0x10   :  { %258 = shalt.err (!%p255_p7)
}
  0x11   :  { %s310_s25 = smov 128   ;;  %s311_s26 = smov 8  }
  0x12   :  { %23 = dma.hbm_to_vmem [thread:$0]  %s390_s0, 256, %s18_s16, [#allocation3], %s310_s25, %s310_s25, %s311_s26  }
  0x13   :  { %s312_s29 = smov [#allocation5]   ;;  %s259_s7 = scalar_lea.hbm %s391_s1, 512 }
  0x14   :  { %s29_s30 = sshll.u32 %s312_s29, 4  ;;  %p260_p8 = scmp.ne.s32.totalorder %s391_s1, %s259_s7  ;;  %s30_s30 = int_to_ptr.vmem [resolvable:$true] %s29_s30 }
  0x15   :  { %p263_p9 = scmp.lt.u32.totalorder %s259_s7, %s391_s1 }
  0x17   :  { %p265_p10 = pnand %p263_p9, %p260_p8 }
  0x19   :  { %268 = shalt.err (!%p265_p10)
}
  0x1a   :  { %s269_s12 = scalar_lea.vmem %s30_s30, 512  ;;  %p274_p12 = scmp.lt.s32.totalorder %s30_s30, %s30_s30 }
  0x1b   :  { %p270_p11 = scmp.ne.s32.totalorder %s30_s30, %s269_s12  ;;  %p275_p13 = scmp.lt.s32.totalorder %s269_s12, %s269_s12 }
  0x1d   :  { %p276_p0 = por %p275_p13, %p274_p12 }
  0x1f   :  { %p277_p1 = pnand %p276_p0, %p270_p11 }
  0x21   :  { %280 = shalt.err (!%p277_p1)
}
  0x22   :  { %35 = dma.hbm_to_vmem [thread:$0]  %s391_s1, 512, %s30_s30, [#allocation6], %s310_s25, %s310_s25, %s311_s26  }
  0x23   :  { %303 = dma.done.wait [#allocation3], 256  }
  0x24   :  { %304 = vsyncadd [#allocation3], 4294967040 }
  0x25   :  { %305 = dma.done.wait [#allocation6], 512  }
  0x26   :  { %306 = vsyncadd [#allocation6], 4294966784  ;;  %vm52_vm0 = vcmask 261120   ;;  %v48_v0 = vld [vmem:[#allocation5] sm:$0xff]  ;;  %v49_v1 = vld [vmem:[#allocation5 + $0x8] sm:$0xff]  ;;  %s313_s17 = smov [#allocation7]  }
  0x27   :  { %v50_v2 = vld [vmem:[#allocation5 + $0x10] sm:$0xff]  ;;  %v222_v3 = vpack.c.bf16 %v49_v1, %v48_v0  ;;  %v51_v4 = vld [vmem:[#allocation5 + $0x18] sm:$0xff]  ;;  %s188_s18 = sshll.u32 %s313_s17, 4  ;;  %s189_s18 = int_to_ptr.vmem [resolvable:$true] %s188_s18 }
  0x28   :  { %v46_v5 = vld [vmem:[#allocation2] sm:$0xff]  ;;  %v226_v6 = vpack.c.bf16 %v51_v4, %v50_v2  ;;  %v47_v7 = vld [vmem:[#allocation2 + $0x8] sm:$0xff]  ;;  %s281_s19 = scalar_lea.vmem %s189_s18, 256  ;;  %p286_p3 = scmp.lt.s32.totalorder %s189_s18, %s189_s18 }
  0x29   :  { %219 = vmatprep.mubr.msk.f32.mxu0 %vm52_vm0, %v46_v5  ;;  %223 = vmatprep.subr.bf16.mxu0 %v222_v3  ;;  %v203_v35 = vld [vmem:[%s392_s2] ss:$0 sm:$0xff]  ;;  %p282_p2 = scmp.ne.s32.totalorder %s189_s18, %s281_s19  ;;  %p287_p4 = scmp.lt.s32.totalorder %s281_s19, %s281_s19 }
  0x2a   :  { %225 = vmatpush3.bf16.msra.mxu0 %v222_v3  ;;  %v204_v38 = vld [vmem:[%s393_s3] ss:$0 sm:$0xff] }
  0x2b   :  { %227 = vmatprep.subr.bf16.mxu0 %v226_v6  ;;  %p288_p5 = por %p287_p4, %p286_p3 }
  0x2d   :  { %p289_p6 = pnand %p288_p5, %p282_p2 }
  0x2e   :  { %229 = vmatpush3.bf16.msra.mxu0 %v226_v6 }
  0x31   :  { %220 = vmatmul.mubr.msk.f32.vlgmr.msra.gmra.mrb[0].mxu0 %vm52_vm0, %v47_v7 }
 0x104   :  { %v221_v8 = vpop.f32.mrb[0].mxu0 }
 0x105   :  { %v143_v9 = vmul.f32 %v221_v8, %v221_v8  ;;  %v125_v10 = vpop.f32.mrb[1].mxu0 }
 0x106   :  { %v134_v11 = vadd.f32 %v221_v8, %v125_v10  ;;  %v142_v12 = vmul.f32 %v125_v10, %v125_v10 }
 0x108   :  { %v135_v13 = vrot.slane %v134_v11, 4  ;;  %v144_v14 = vadd.f32 %v143_v9, %v142_v12 }
 0x10a   :  { %v136_v15 = vadd.f32 %v135_v13, %v134_v11  ;;  %v145_v16 = vrot.slane %v144_v14, 4 }
 0x10c   :  { %v137_v17 = vrot.slane %v136_v15, 2  ;;  %v146_v18 = vadd.f32 %v145_v16, %v144_v14 }
 0x10e   :  { %v138_v19 = vadd.f32 %v137_v17, %v136_v15  ;;  %v147_v20 = vrot.slane %v146_v18, 2 }
 0x110   :  { %v139_v21 = vrot.slane %v138_v19, 1  ;;  %v148_v22 = vadd.f32 %v147_v20, %v146_v18 }
 0x112   :  { %v140_v23 = vadd.f32 %v139_v21, %v138_v19  ;;  %v149_v24 = vrot.slane %v148_v22, 1 }
 0x114   :  { %v141_v25 = vmul.f32 0.0625, %v140_v23  ;;  %v150_v26 = vadd.f32 %v149_v24, %v148_v22 }
 0x116   :  { %v151_v27 = vmul.f32 0.0625, %v150_v26  ;;  %v152_v28 = vmul.f32 %v141_v25, %v141_v25  ;;  %v155_v29 = vsub.f32 %v125_v10, %v141_v25  ;;  %v156_v30 = vsub.f32 %v221_v8, %v141_v25 }
 0x118   :  { %v153_v31 = vsub.f32 %v151_v27, %v152_v28 }
 0x11a   :  { %v154_v32 = vmax.f32 %v153_v31, 0.0 }
 0x11c   :  { %v157_v33 = vadd.f32 1e-05, %v154_v32 }
 0x11e   :  { %235 = vrsqrt.f32 %v157_v33 }
 0x128   :  { %v236_v34 = vpop.eup %235 }
 0x129   :  { %v159_v36 = vmul.f32 %v236_v34, %v155_v29  ;;  %v160_v37 = vmul.f32 %v236_v34, %v156_v30 }
 0x12b   :  { %v168_v39 = vmul.f32 %v203_v35, %v159_v36  ;;  %v169_v40 = vmul.f32 %v203_v35, %v160_v37 }
 0x12d   :  { %v177_v41 = vadd.f32 %v204_v38, %v168_v39  ;;  %v178_v42 = vadd.f32 %v204_v38, %v169_v40 }
 0x12f   :  { %v179_v43 = vmax.f32 %v177_v41, 0.0  ;;  %v180_v44 = vmax.f32 %v178_v42, 0.0 }
 0x131   :  { %181 = vst [vmem:[#allocation7] sm:$0xff] %v179_v43  ;;  %182 = vst [vmem:[#allocation7 + $0x8] sm:$0xff] %v180_v44 }
 0x132   :  { %292 = shalt.err (!%p289_p6)
}
 0x133   :  { %s293_s20 = scalar_lea.hbm %s394_s4, 256 }
 0x134   :  { %p294_p7 = scmp.ne.s32.totalorder %s394_s4, %s293_s20  ;;  %p297_p8 = scmp.lt.u32.totalorder %s293_s20, %s394_s4 }
 0x136   :  { %p299_p9 = pnand %p297_p8, %p294_p7 }
 0x138   :  { %302 = shalt.err (!%p299_p9)
}
 0x139   :  { %194 = dma.vmem_to_hbm [thread:$0]  %s189_s18, 256, %s394_s4, [#allocation4], %s310_s25, %s310_s25, %s311_s26  }
 0x13a   :  { %307 = dma.done.wait [#allocation4], 256  }
 0x13b   :  { %308 = vsyncadd [#allocation4], 4294967040 }
 0x13c   :  { %198 = vsyncpa [#allocation3], 1 }
 0x13d   :  { %199 = vsyncpa [#allocation6], 1 }
 0x13e   :  { %200 = vsyncpa [#allocation4], 1 }

</bundles_post_ra>
